<compile_context>
chip_gen: v5e
topology: v5e:2x2
jax: 0.10.0
libtpu: 0.0.40
codegen_flags: <defaults>
</compile_context>

<pallas_src>
import functools

import jax
import jax.numpy as jnp
from jax.experimental import pallas as pl
from jax.experimental.pallas import tpu as pltpu

_LANES = 128
_MAX_ROW_TILE = 2048  # 2048*128 px * C=3 f32 = ~3 MB / step, ~6 MB double-buffered


def _choose_row_tile(n_rows, max_rows=_MAX_ROW_TILE):
    """Pick a sublane-dim tile: full extent if small, else a multiple of 8."""
    if n_rows <= max_rows:
        return n_rows                      # equals full dim -> always legal
    for rt in range(max_rows, 0, -8):      # multiples of 8, prefer divisors
        if n_rows % rt == 0:
            return rt
    return max_rows                        # ragged last tile; kernel masks it


def _net_kernel(seed_ref, w_ref, b_ref, x_ref, o_ref, *,
                n_chan, r_tile, acc_rows, grid_r, hw, need_mask, training,
                p_drop):
    # seed_ref : SMEM (1,)  int32  -- dropout PRNG seed (unused in eval)
    # w_ref    : SMEM (C,)  f32    -- 1x1 conv weights (keep-scale pre-folded)
    # b_ref    : SMEM (1,)  f32    -- conv bias (keep-scale pre-folded)
    # x_ref    : VMEM (1, C, r_tile, 128) f32 -- pixel slab for this (n, s, r)
    # o_ref    : VMEM (1, 1, acc_rows, 128) f32 -- small resident accumulator
    n = pl.program_id(0)
    s = pl.program_id(1)
    r = pl.program_id(2)
    ns = pl.num_programs(1)
    nr = pl.num_programs(2)

    @pl.when(r == 0)
    def _():
        o_ref[...] = jnp.zeros_like(o_ref)

    # 1x1 conv over channels == scalar*vector FMAs on the VPU (no MXU).
    y = x_ref[0, 0] * w_ref[0]
    for c in range(1, n_chan):
        y = y + x_ref[0, c] * w_ref[c]
    y = y + b_ref[0]
    y = jnp.maximum(y, 0.0)                       # ReLU

    if training:
        # Training-mode dropout (p = p_drop). Keep-decision is an integer
        # threshold test on raw PRNG bits; the 1/(1-p) scale is already folded
        # into w and b by the wrapper. RNG stream differs from torch's.
        step = (n * ns + s) * nr + r
        pltpu.prng_seed(seed_ref[0] + step)
        bits = pltpu.bitcast(pltpu.prng_random_bits(y.shape), jnp.uint32)
        threshold = jnp.uint32(min(int(p_drop * (1 << 32)), (1 << 32) - 1))
        y = jnp.where(bits >= threshold, y, 0.0)
    # Eval-mode dropout is identity (matches model.eval()).

    if need_mask:
        # Only emitted when HW doesn't divide the tiling: zero out padded /
        # out-of-bounds pixels so they can't contribute relu(bias) garbage.
        row = jax.lax.broadcasted_iota(jnp.int32, y.shape, 0)
        lane = jax.lax.broadcasted_iota(jnp.int32, y.shape, 1)
        blk = s * grid_r + r
        pix = (blk * r_tile + row) * _LANES + lane
        y = jnp.where(pix < hw, y, 0.0)

    # Fold the (r_tile, 128) slab into a small vreg-aligned accumulator with
    # pure vreg-wise VPU adds (tile-aligned reshape: no layout change).
    if acc_rows != r_tile:
        y = y.reshape(r_tile // acc_rows, acc_rows, _LANES).sum(axis=0)
    o_ref[0, 0] = o_ref[0, 0] + y


def net_forward(x_nchw, weight, bias, *, training=False, p_drop=0.5, seed=0,
                max_row_tile=_MAX_ROW_TILE):
    """weight: (1, C_in, 1, 1), bias: (1,). Returns scalar f32 = dropout(relu(conv(x))).sum()."""
    N, C, H, W = x_nchw.shape
    HW = H * W

    w = weight.reshape(C).astype(jnp.float32)
    b = bias.reshape(1).astype(jnp.float32)
    if training:
        if p_drop >= 1.0:
            return jnp.zeros((), jnp.float32)  # everything dropped
        # Fold the dropout keep-scale into the conv: relu(s*z) = s*relu(z), s>0.
        scale = jnp.float32(1.0 / (1.0 - p_drop))
        w = w * scale
        b = b * scale

    # Free, contiguous reshape (no transpose, no HBM round trip).
    x3 = x_nchw.reshape(N, C, HW).astype(jnp.float32)
    hw_pad = pl.cdiv(HW, _LANES) * _LANES
    if hw_pad != HW:
        # TODO(synk): rare non-multiple-of-128 spatial sizes take one pad copy.
        x3 = jnp.pad(x3, ((0, 0), (0, 0), (0, hw_pad - HW)))
    n_rows = hw_pad // _LANES
    r_tile = _choose_row_tile(n_rows, max_row_tile)
    total_rblocks = pl.cdiv(n_rows, r_tile)
    x4 = x3.reshape(N, C, n_rows, _LANES)

    # Parallel split of the row-block axis so v7x's two TensorCores both get
    # work even when N == 1 (harmless on single-TC v5e/v6e).
    n_split = 2 if (total_rblocks >= 2 and total_rblocks % 2 == 0) else 1
    grid_r = total_rblocks // n_split

    # Small vreg-aligned accumulator: (8, 128) unless the whole problem is
    # smaller than one vreg tile in the sublane dim.
    acc_rows = 8 if r_tile % 8 == 0 else r_tile

    need_mask = (hw_pad != HW) or (n_rows % r_tile != 0)

    kernel = functools.partial(
        _net_kernel, n_chan=C, r_tile=r_tile, acc_rows=acc_rows,
        grid_r=grid_r, hw=HW, need_mask=need_mask, training=training,
        p_drop=p_drop)

    bytes_accessed = (N * C * n_rows * _LANES * 4
                      + N * n_split * acc_rows * _LANES * 4)
    cost = pl.CostEstimate(flops=5 * N * C * HW, transcendentals=0,
                           bytes_accessed=bytes_accessed)

    partials = pl.pallas_call(
        kernel,
        out_shape=jax.ShapeDtypeStruct((N, n_split, acc_rows, _LANES),
                                       jnp.float32),
        grid=(N, n_split, grid_r),
        in_specs=[
            pl.BlockSpec(memory_space=pltpu.SMEM),                      # seed
            pl.BlockSpec(memory_space=pltpu.SMEM),                      # weights (C,)
            pl.BlockSpec(memory_space=pltpu.SMEM),                      # bias (1,)
            pl.BlockSpec((1, C, r_tile, _LANES),
                         lambda n, s, r: (n, 0, s * grid_r + r, 0)),
        ],
        out_specs=pl.BlockSpec((1, 1, acc_rows, _LANES),
                               lambda n, s, r: (n, s, 0, 0)),
        compiler_params=pltpu.CompilerParams(
            dimension_semantics=("parallel", "parallel", "arbitrary")),
        cost_estimate=cost,
    )(
        jnp.array([seed], jnp.int32),
        w,
        b,
        x4,
    )
    # Tiny final reduction (N * n_split * 8 * 128 f32) done by XLA.
    return jnp.sum(partials)


def _reference(x, weight, bias):
    """Pure-JAX eval-mode reference (dropout == identity)."""
    C = x.shape[1]
    return jnp.sum(
        jnp.maximum(
            jnp.einsum("nchw,c->nhw", x, weight.reshape(C)) + bias[0], 0.0))


if __name__ == "__main__":
    key = jax.random.PRNGKey(0)
    kx, kw, kb, kx2, kx3 = jax.random.split(key, 5)

    # Weights consistent with Conv2d(3, 1, 1).
    weight = jax.random.normal(kw, (1, 3, 1, 1), dtype=jnp.float32) * 0.1
    bias = jax.random.normal(kb, (1,), dtype=jnp.float32) * 0.1

    # 1) Primary small case: batch=2, C=3, 16x16 spatial.
    x = jax.random.normal(kx, (2, 3, 16, 16), dtype=jnp.float32)
    result = jax.block_until_ready(net_forward(x, weight, bias, training=False))
    ref = _reference(x, weight, bias)
    assert jnp.allclose(result, ref, rtol=1e-4, atol=1e-3), (result, ref)

    # 2) Exercise the multi-row-block reduction + 2-way parallel split + fold
    #    paths by shrinking the row tile (small shape, forced tiling).
    x2 = jax.random.normal(kx2, (1, 3, 32, 128), dtype=jnp.float32)
    r2 = jax.block_until_ready(
        net_forward(x2, weight, bias, training=False, max_row_tile=8))
    ref2 = _reference(x2, weight, bias)
    assert jnp.allclose(r2, ref2, rtol=1e-4, atol=1e-3), (r2, ref2)

    # 3) Exercise the ragged-HW pad + mask path (HW % 128 != 0).
    x3 = jax.random.normal(kx3, (2, 3, 10, 10), dtype=jnp.float32)
    r3 = jax.block_until_ready(net_forward(x3, weight, bias, training=False))
    ref3 = _reference(x3, weight, bias)
    assert jnp.allclose(r3, ref3, rtol=1e-4, atol=1e-3), (r3, ref3)

    print("KERNEL_OK")
</pallas_src>

<mosaic_0001>
module attributes {stable_mosaic.version = 11 : i64} {
  func.func @_net_kernel(%arg0: i32, %arg1: i32, %arg2: i32, %arg3: memref<1xi32, #tpu.memory_space<smem>>, %arg4: memref<3xf32, #tpu.memory_space<smem>>, %arg5: memref<1xf32, #tpu.memory_space<smem>>, %arg6: memref<1x3x2x128xf32, #tpu.memory_space<vmem>>, %arg7: memref<1x1x2x128xf32, #tpu.memory_space<vmem>>) attributes {dimension_semantics = [#tpu.dimension_semantics<parallel>, #tpu.dimension_semantics<parallel>, #tpu.dimension_semantics<arbitrary>], iteration_bounds = array<i64: 2, 1, 1>, scalar_prefetch = 0 : i64, scratch_operands = 0 : i64, tpu.core_type = #tpu.core_type<tc>, window_params = [{transform_indices = @transform_0, window_bounds = array<i64: 1>}, {transform_indices = @transform_1, window_bounds = array<i64: 3>}, {transform_indices = @transform_2, window_bounds = array<i64: 1>}, {transform_indices = @transform_3, window_bounds = array<i64: 1, 3, 2, 128>}, {transform_indices = @transform_4, window_bounds = array<i64: 1, 1, 2, 128>}]} {
    %c0_i32 = arith.constant 0 : i32
    %0 = arith.cmpi eq, %arg2, %c0_i32 : i32
    %1 = arith.extui %0 : i1 to i32
    %c0_i32_0 = arith.constant 0 : i32
    %2 = arith.cmpi ne, %1, %c0_i32_0 : i32
    scf.if %2 {
      %cst_22 = arith.constant 0.000000e+00 : f32
      %31 = vector.broadcast %cst_22 : f32 to vector<1x1x2x128xf32>
      %c0_23 = arith.constant 0 : index
      %c0_24 = arith.constant 0 : index
      %c0_25 = arith.constant 0 : index
      %c0_26 = arith.constant 0 : index
      %32 = vector.load %arg7[%c0_23, %c0_24, %c0_25, %c0_26] : memref<1x1x2x128xf32, #tpu.memory_space<vmem>>, vector<1x1x2x128xf32>
      tpu.vector_store %arg7[%c0_23, %c0_24, %c0_25, %c0_26], %31 {strides = array<i32>} : memref<1x1x2x128xf32, #tpu.memory_space<vmem>>, vector<1x1x2x128xf32>,
    } else {
    }
    %c0 = arith.constant 0 : index
    %c0_1 = arith.constant 0 : index
    %c0_2 = arith.constant 0 : index
    %c0_3 = arith.constant 0 : index
    %3 = vector.load %arg6[%c0, %c0_1, %c0_2, %c0_3] : memref<1x3x2x128xf32, #tpu.memory_space<vmem>>, vector<1x1x2x128xf32>
    %4 = vector.shape_cast %3 : vector<1x1x2x128xf32> to vector<2x128xf32>
    %c0_4 = arith.constant 0 : index
    %5 = memref.load %arg4[%c0_4] : memref<3xf32, #tpu.memory_space<smem>>
    %6 = vector.broadcast %5 : f32 to vector<2x128xf32>
    %7 = arith.mulf %4, %6 : vector<2x128xf32>
    %c0_5 = arith.constant 0 : index
    %c1 = arith.constant 1 : index
    %c0_6 = arith.constant 0 : index
    %c0_7 = arith.constant 0 : index
    %8 = vector.load %arg6[%c0_5, %c1, %c0_6, %c0_7] : memref<1x3x2x128xf32, #tpu.memory_space<vmem>>, vector<1x1x2x128xf32>
    %9 = vector.shape_cast %8 : vector<1x1x2x128xf32> to vector<2x128xf32>
    %c1_8 = arith.constant 1 : index
    %10 = memref.load %arg4[%c1_8] : memref<3xf32, #tpu.memory_space<smem>>
    %11 = vector.broadcast %10 : f32 to vector<2x128xf32>
    %12 = arith.mulf %9, %11 : vector<2x128xf32>
    %13 = arith.addf %7, %12 : vector<2x128xf32>
    %c0_9 = arith.constant 0 : index
    %c2 = arith.constant 2 : index
    %c0_10 = arith.constant 0 : index
    %c0_11 = arith.constant 0 : index
    %14 = vector.load %arg6[%c0_9, %c2, %c0_10, %c0_11] : memref<1x3x2x128xf32, #tpu.memory_space<vmem>>, vector<1x1x2x128xf32>
    %15 = vector.shape_cast %14 : vector<1x1x2x128xf32> to vector<2x128xf32>
    %c2_12 = arith.constant 2 : index
    %16 = memref.load %arg4[%c2_12] : memref<3xf32, #tpu.memory_space<smem>>
    %17 = vector.broadcast %16 : f32 to vector<2x128xf32>
    %18 = arith.mulf %15, %17 : vector<2x128xf32>
    %19 = arith.addf %13, %18 : vector<2x128xf32>
    %c0_13 = arith.constant 0 : index
    %20 = memref.load %arg5[%c0_13] : memref<1xf32, #tpu.memory_space<smem>>
    %21 = vector.broadcast %20 : f32 to vector<2x128xf32>
    %22 = arith.addf %19, %21 : vector<2x128xf32>
    %cst = arith.constant 0.000000e+00 : f32
    %23 = vector.broadcast %cst : f32 to vector<2x128xf32>
    %24 = arith.maximumf %22, %23 : vector<2x128xf32>
    %c0_14 = arith.constant 0 : index
    %c0_15 = arith.constant 0 : index
    %c0_16 = arith.constant 0 : index
    %c0_17 = arith.constant 0 : index
    %25 = vector.load %arg7[%c0_14, %c0_15, %c0_16, %c0_17] : memref<1x1x2x128xf32, #tpu.memory_space<vmem>>, vector<1x1x2x128xf32>
    %26 = vector.shape_cast %25 : vector<1x1x2x128xf32> to vector<2x128xf32>
    %27 = arith.addf %26, %24 : vector<2x128xf32>
    %c0_18 = arith.constant 0 : index
    %c0_19 = arith.constant 0 : index
    %c0_20 = arith.constant 0 : index
    %c0_21 = arith.constant 0 : index
    %28 = vector.load %arg7[%c0_18, %c0_19, %c0_20, %c0_21] : memref<1x1x2x128xf32, #tpu.memory_space<vmem>>, vector<1x1x2x128xf32>
    %29 = vector.shape_cast %28 : vector<1x1x2x128xf32> to vector<2x128xf32>
    %30 = vector.shape_cast %27 : vector<2x128xf32> to vector<1x1x2x128xf32>
    tpu.vector_store %arg7[%c0_18, %c0_19, %c0_20, %c0_21], %30 {strides = array<i32>} : memref<1x1x2x128xf32, #tpu.memory_space<vmem>>, vector<1x1x2x128xf32>,
    return
  }
  func.func @transform_0(%arg0: i32, %arg1: i32, %arg2: i32) -> i32 {
    %c0_i32 = arith.constant 0 : i32
    %c0_i32_0 = arith.constant 0 : i32
    return %c0_i32 : i32
  }
  func.func @transform_1(%arg0: i32, %arg1: i32, %arg2: i32) -> i32 {
    %c0_i32 = arith.constant 0 : i32
    %c0_i32_0 = arith.constant 0 : i32
    return %c0_i32 : i32
  }
  func.func @transform_2(%arg0: i32, %arg1: i32, %arg2: i32) -> i32 {
    %c0_i32 = arith.constant 0 : i32
    %c0_i32_0 = arith.constant 0 : i32
    return %c0_i32 : i32
  }
  func.func @transform_3(%arg0: i32, %arg1: i32, %arg2: i32) -> (i32, i32, i32, i32) {
    %c1_i32 = arith.constant 1 : i32
    %0 = arith.muli %arg1, %c1_i32 : i32
    %1 = arith.addi %0, %arg2 : i32
    %c0_i32 = arith.constant 0 : i32
    %c0_i32_0 = arith.constant 0 : i32
    %c0_i32_1 = arith.constant 0 : i32
    return %arg0, %c0_i32, %1, %c0_i32_0 : i32, i32, i32, i32
  }
  func.func @transform_4(%arg0: i32, %arg1: i32, %arg2: i32) -> (i32, i32, i32, i32) {
    %c0_i32 = arith.constant 0 : i32
    %c0_i32_0 = arith.constant 0 : i32
    %c0_i32_1 = arith.constant 0 : i32
    return %arg0, %arg1, %c0_i32, %c0_i32_0 : i32, i32, i32, i32
  }
}

</mosaic_0001>

<bundles_post_ra>
// kernel: tpu_custom_call.1
= control target key start
LH: loop header
LB: loop body
LE: loop exit
PB: predicated region body
PF: predicated region fallthrough
CT: control target
= control target key end

     0   :  { %s817_s0 = inlined_call_operand.<no memory space> [shape: s32[1], index: 0, kind: input, shape index: {}]   ;;  %s818_s1 = inlined_call_operand.vmem [shape: f32[3], index: 1, kind: input, shape index: {}]   ;;  %s819_s2 = inlined_call_operand.<no memory space> [shape: f32[1], index: 2, kind: input, shape index: {}]   ;;  %s820_s3 = inlined_call_operand.hbm [shape: f32[2,3,2,128], index: 3, kind: input, shape index: {}]   ;;  %s821_s4 = inlined_call_operand.hbm [shape: f32[2,1,2,128], index: 4, kind: output, shape index: {}]  }
   0x1   :  { %10 = sst [smem:[#allocation3]] %s819_s2 }
   0x2   :  { %11 = vsyncpa [#allocation7], 0 }
   0x3   :  { %12 = vsyncpa [#allocation5], 0 }
   0x4   :  { %14 = vsyncpa [#allocation5 + $0x1], 0 }
   0x5   :  { %15 = vsyncpa [#allocation6], 0 }
   0x6   :  { %17 = vsyncpa [#allocation6 + $0x1], 0  ;;  %s665_s0 = smov 0   ;;  %s667_s17 = smov 0  }
   0x7   :  { %s669_s18 = smov 0   ;;  %s671_s19 = smov 0  }
   0x8   :  { %s673_s20 = smov 0   ;;  %s675_s21 = smov 0  }
   0x9 LB: > { %s404_s2 = sadd.s32 4294967295, %s631_s21   ;;  %s405_s22 = sadd.s32 4294967294, %s631_s21   ;;  %s631_s21 = sphi %s675_s21, %s23_s21   ;;  %s627_s20 = sphi %s673_s20, %s833_s20   ;;  %s623_s19 = sphi %s671_s19, %s832_s19   ;;  %s619_s18 = sphi %s669_s18, %s831_s18   ;;  %s615_s17 = sphi %s667_s17, %s830_s17   ;;  %s611_s0 = sphi %s665_s0, %s829_s0  }
   0xa   : > { %s116_s23 = sadd.s32 1, %s619_s18  ;;  %p123_p0 = scmp.ne.s32.totalorder %s619_s18, %s615_s17 }
   0xb   : > { %p124_p1 = scmp.eq.s32.totalorder %s631_s21, 0  ;;  %p129_p2 = scmp.ne.s32.totalorder %s615_s17, %s611_s0 }
   0xc   : > { %p703_p3 = scmp.eq.s32.totalorder %s404_s2, 0  ;;  %p155_p4 = scmp.eq.s32.totalorder %s404_s2, 1 }
   0xd   : > { %p707_p5 = por %p124_p1, %p123_p0  ;;  %p161_p6 = scmp.eq.s32.totalorder %s405_s22, 1 }
   0xe   : > { %p713_p7 = por %p703_p3, %p129_p2  ;;  %p717_p8 = por %p155_p4, %p123_p0 }
   0xf   : > { %p721_p9 = por %p161_p6, %p129_p2  ;;  %p406_p10 = scmp.ge.s32.totalorder %s631_s21, 1 }
  0x10   : > { %p168_p11 = scmp.lt.s32.totalorder %s631_s21, 3  ;;  %s183_s5 = sshll.u32 %s818_s1, 4  ;;  %s184_s5 = int_to_ptr.vmem [resolvable:$true] %s183_s5 }
  0x11   : > { %p408_p13 = scmp.ge.s32.totalorder %s631_s21, 2  ;;  %p445_p0 = scmp.lt.s32.totalorder %s631_s21, 2 }
  0x12   : > { %p730_p12 = pnand %p406_p10, %p168_p11  ;;  %s42_s8 = sadd.s32 1, %s627_s20 }
  0x13   : > { %p740_p2 = pnand %p445_p0, %p707_p5  ;;  %p44_p6 = scmp.ge.s32.totalorder %s42_s8, 2 }
  0x14   : > { %p432_p1 = pneg %p730_p12  ;;  %s197_s9 = sand.u32 1, %s619_s18  }
  0x15   : > { %s633_s10 = smov [#allocation4]   ;;  %s835_s8 = smov (%p44_p6, %s42_s8), 0 }
  0x16   : > { %p433_p4 = pnand %p432_p1, %p703_p3  ;;  %s421_s11 = smul.u32 6, %s197_s9 }
  0x17   : > { %s111_s12 = ssub.s32 %s627_s20, %s835_s8  ;;  %s422_s13 = smul.u32 6, %s627_s20 }
  0x18   : > { %435 = dma.vmem_to_smem (!%p433_p4), %s184_s5, 16, %s633_s10, [#allocation7]  }
  0x19   : > { %p114_p10 = scmp.eq.s32.totalorder %s111_s12, 0  ;;  %s208_s16 = scalar_lea.hbm %s820_s3, %s422_s13 }
  0x1a   : > { %s201_s2 = scalar_lea.vmem [#allocation8], %s421_s11  ;;  %s209_s29 = sshll.u32 %s208_s16, 4  ;;  %s210_s29 = int_to_ptr.hbm [resolvable:$true] %s209_s29 }
  0x1b   : > { %s211_s22 = sshll.u32 %s201_s2, 4  ;;  %s198_s30 = scalar_lea.sflag [#allocation5], %s197_s9  ;;  %s212_s22 = int_to_ptr.vmem [resolvable:$true] %s211_s22 }
  0x1c   : > { %s759_s25 = scalar_select %p114_p10, %s619_s18, %s116_s23  }
  0x1d   : > { %s634_s5 = smov 32   ;;  %s635_s10 = smov 2  }
  0x1e   : > { %439 = dma.hbm_to_vmem [thread:$0]  (!%p740_p2), %s210_s29, 96, %s212_s22, %s198_s30, %s634_s5, %s634_s5, %s635_s10  }
  0x1f   : > { %223 = sbr.rel (%p730_p12) target bundleno = 67 (0x43), region = 36 }
  0x24   : > { %598 = dma.done.wait (%p703_p3), [#allocation7], 16  }
  0x25   : > { %600 = vsyncadd (%p703_p3), [#allocation7], 4294967280  ;;  %s770_s23 = sand.u32 1, %s615_s17  }
  0x26   : > { %s423_s9 = smul.u32 6, %s770_s23  ;;  %s231_s11 = scalar_lea.sflag [#allocation5], %s770_s23 }
  0x28   : > { %s234_s12 = scalar_lea.vmem [#allocation8], %s423_s9 }
  0x29   : > { %602 = dma.done.wait (%p713_p7), %s231_s11, 96  }
  0x2a   : > { %604 = vsyncadd (%p713_p7), %s231_s11, 4294967200 }
  0x2b   : > { %240 = sfence }
  0x2c   : > { %s412_s6 = sshll.u32 %s770_s23, 1  ;;  %s268_s7 = sld [smem:[#allocation4]]  ;;  %v636_v0 = vmov 0.0   ;;  %v267_v1 = vld [vmem:[%s234_s12] sm:$0x3] }
  0x2d   : > { %s414_s24 = sld [smem:[#allocation4 + $0x1]]  ;;  %s260_s13 = scalar_lea.vmem [#allocation9], %s412_s6  ;;  %v413_v2 = vld [vmem:[%s234_s12 + $0x2] sm:$0x3]  ;;  %v415_v4 = vld [vmem:[%s234_s12 + $0x4] sm:$0x3] }
  0x2e   : > { %266 = vst [vmem:[%s260_s13] sm:$0x3] %v636_v0  ;;  %s416_s14 = sld [smem:[#allocation4 + $0x2]]  ;;  %s418_s26 = sshll.u32 %s623_s19, 1 }
  0x2f   : > { %s283_s15 = sld [smem:[#allocation3]]  ;;  %s302_s22 = scalar_lea.hbm %s821_s4, %s418_s26 }
  0x30   : > { %s304_s29 = sshll.u32 %s260_s13, 4  ;;  %s306_s30 = sshll.u32 %s302_s22, 4  ;;  %s305_s29 = int_to_ptr.vmem [resolvable:$true] %s304_s29  ;;  %s307_s30 = int_to_ptr.hbm [resolvable:$true] %s306_s30 }
  0x31   : > { %s291_s5 = scalar_lea.sflag [#allocation6], %s770_s23  ;;  %s559_s10 = sshra.s32 %s307_s30, 4  ;;  %s560_s10 = int_to_ptr.hbm [resolvable:$true] %s559_s10 }
  0x32   : > { %v269_v3 = vstv %s268_s7  ;;  %s561_s19 = scalar_lea.hbm %s560_s10, 2  ;;  %s565_s12 = scalar_lea.hbm %s821_s4, 4 }
  0x33   : > { %v270_v5 = vmul.f32 %v269_v3, %v267_v1  ;;  %v274_v6 = vstv %s414_s24  ;;  %p562_p3 = scmp.ne.s32.totalorder %s560_s10, %s561_s19  ;;  %p566_p11 = scmp.lt.s32.totalorder %s560_s10, %s821_s4 }
  0x34   : > { %v275_v7 = vmul.f32 %v413_v2, %v274_v6  ;;  %v280_v8 = vstv %s416_s14  ;;  %p567_p12 = scmp.lt.s32.totalorder %s565_s12, %s561_s19 }
  0x35   : > { %v281_v9 = vmul.f32 %v415_v4, %v280_v8  ;;  %v284_v11 = vstv %s283_s15  ;;  %v287_v14 = vld [vmem:[%s260_s13] sm:$0x3]  ;;  %p563_p5 = pnand %p562_p3, %p717_p8 }
  0x36   : > { %v276_v10 = vadd.f32 %v275_v7, %v270_v5  ;;  %p568_p0 = por %p567_p12, %p566_p11 }
  0x37   : > { %p564_p7 = pneg %p563_p5 }
  0x38   : > { %v282_v12 = vadd.f32 %v281_v9, %v276_v10 }
  0x39   : > { %p569_p1 = pnand %p568_p0, %p564_p7 }
  0x3a   : > { %v285_v13 = vadd.f32 %v284_v11, %v282_v12 }
  0x3c   : > { %v286_v15 = vmax.f32 %v285_v13, 0.0 }
  0x3e   : > { %v288_v16 = vadd.f32 %v287_v14, %v286_v15 }
  0x40   : > { %289 = vst [vmem:[%s260_s13] sm:$0x3] %v288_v16 }
  0x41   : > { %572 = shalt.err (!%p569_p1)
}
  0x42   : > { %430 = dma.vmem_to_hbm [thread:$0]  (%p717_p8), %s305_s29, 32, %s307_s30, %s291_s5  }
  0x43 PF: > { %s318_s23 = sand.u32 1, %s611_s0   ;;  %p441_p2 = pnand %p408_p13, %p721_p9 }
  0x44   : > { %s319_s24 = scalar_lea.sflag [#allocation6], %s318_s23 }
  0x45   : > { %p442_p4 = pneg %p441_p2 }
  0x47   : > { %606 = dma.done.wait (%p442_p4), %s319_s24, 32  }
  0x48   : > { %608 = vsyncadd (%p442_p4), %s319_s24, 4294967264  ;;  %s23_s21 = sadd.s32 1, %s631_s21   ;;  %s829_s0 = smov %s615_s17 }
  0x49   : > { %p20_p6 = scmp.ge.s32.totalorder %s23_s21, 4   ;;  %s830_s17 = smov %s619_s18 }
  0x4a   : > { %s831_s18 = smov %s759_s25  ;;  %s832_s19 = smov %s627_s20 }
  0x4b   : > { %s833_s20 = smov %s835_s8  ;;  %22 = sbr.rel (!%p20_p6) target bundleno = 9 (0x9), region = 92 }
  0x50   :  { %325 = vsyncpa [#allocation5], 1 }
  0x51   :  { %327 = vsyncpa [#allocation5 + $0x1], 1 }
  0x52   :  { %328 = vsyncpa [#allocation6], 1 }
  0x53   :  { %330 = vsyncpa [#allocation6 + $0x1], 1 }
  0x54   :  { %331 = vsyncpa [#allocation7], 1 }
  0x55   :  { %333 = vsyncpa [#allocation7 + $0x1], 1 }

</bundles_post_ra>
